<compile_context>
chip_gen: v5e
topology: v5e:2x2
jax: 0.10.0
libtpu: 0.0.40
codegen_flags: <defaults>
</compile_context>

<pallas_src>
import functools

import jax
import jax.numpy as jnp
from jax.experimental import pallas as pl
from jax.experimental.pallas import tpu as pltpu


def mt_kernel(x_ref, w_ref, b_ref, mask_ref, out_ref, acc_ref, *, cp, inv_scale):
    step = pl.program_id(0)
    nsteps = pl.num_programs(0)

    # Zero the VMEM accumulator on the first step.
    @pl.when(step == 0)
    def _():
        acc_ref[...] = jnp.zeros_like(acc_ref)

    # One fused matmul for teacher+student logits: (tm, D) @ (D, 2*CP) -> f32.
    # x arrives f32 from HBM and is cast to bf16 on the VPU (hidden under MXU).
    x = x_ref[...].astype(jnp.bfloat16)                       # (tm, D)
    logits = jnp.dot(x, w_ref[...],
                     preferred_element_type=jnp.float32) + b_ref[...]

    logits_t = logits[:, :cp]                                 # teacher half
    logits_s = logits[:, cp:]                                 # student half

    def _softmax(z):
        m = jnp.max(z, axis=-1, keepdims=True)
        e = jnp.exp(z - m)                                    # padded cols -> 0
        inv = pl.reciprocal(jnp.sum(e, axis=-1, keepdims=True), approx=True)
        return e * inv

    p_teacher = _softmax(logits_t)     # y_hat.softmax(1).detach()
    p_student = _softmax(logits_s)     # y.softmax(1)

    se = (p_student - p_teacher) ** 2                         # (tm, CP)
    # Reduce over classes first, then apply the per-sample mask (tm, 1).
    per_row = jnp.sum(se, axis=-1, keepdims=True) * mask_ref[...]

    # Accumulate the tile's contribution; 1/(true_C * true_N) is folded into
    # inv_scale so padded class columns / padded (mask==0) rows never bias it.
    acc_ref[...] += jnp.sum(per_row).reshape(1, 1)

    # Write the scalar output only once, at the end of the reduction axis.
    @pl.when(step == nsteps - 1)
    def _():
        out_ref[...] = acc_ref[...] * inv_scale


def mt_forward(x_nchw, w_teacher, b_teacher, w_student, b_student, mask,
               *, block_n=256):
    N, C_in, H, W = x_nchw.shape
    D = C_in * H * W
    C = w_teacher.shape[1]
    CP = max(128, ((C + 127) // 128) * 128)      # lane-padded class width
    NEG = -1e9                                   # bias for padded class columns

    # Batch tile: as large as block_n allows; single grid step when N <= tm.
    n_rounded = ((N + 7) // 8) * 8
    tm = max(8, (min(block_n, n_rounded) // 8) * 8)
    if tm >= 128:
        tm = (tm // 128) * 128                   # keep MXU rows fully filled
    n_pad = ((N + tm - 1) // tm) * tm
    nsteps = n_pad // tm

    # --- x: flatten + pad batch rows; stays f32 (cast to bf16 inside kernel) --
    x2d = x_nchw.reshape(N, D).astype(jnp.float32)
    if n_pad != N:
        x2d = jnp.pad(x2d, ((0, n_pad - N), (0, 0)))

    def pad_w(w):
        return jnp.pad(w.astype(jnp.float32), ((0, 0), (0, CP - C)))

    def pad_b(b):
        return jnp.pad(b.astype(jnp.float32).reshape(1, C),
                       ((0, 0), (0, CP - C)), constant_values=NEG)

    # Fused (D, 2*CP) weight: [teacher | student], each half lane-padded to CP.
    w_cat = jnp.concatenate([pad_w(w_teacher), pad_w(w_student)],
                            axis=1).astype(jnp.bfloat16)
    b_cat = jnp.concatenate([pad_b(b_teacher), pad_b(b_student)], axis=1)  # f32

    # Per-sample mask as a single lane: (n_pad, 1) f32; padded rows get 0.
    mask_col = mask.astype(jnp.float32).reshape(N, 1)
    if n_pad != N:
        mask_col = jnp.pad(mask_col, ((0, n_pad - N), (0, 0)))

    inv_scale = 1.0 / float(C * N)               # true class count / batch size

    # VMEM budget (double-buffered inputs) -> vmem_limit_bytes.
    vmem_bytes = (
        2 * tm * D * 4            # x tile (f32)
        + 2 * D * (2 * CP) * 2    # fused W (bf16, resident)
        + 2 * 1 * (2 * CP) * 4    # fused bias (f32)
        + 2 * tm * 128 * 4        # mask tile (lane-padded in VMEM)
        + (4 << 20)               # scratch / pipeline margin
    )
    vmem_limit = min(96 << 20, max(32 << 20, int(vmem_bytes * 1.25)))

    kernel = functools.partial(mt_kernel, cp=CP, inv_scale=inv_scale)

    out = pl.pallas_call(
        kernel,
        out_shape=jax.ShapeDtypeStruct((1, 1), jnp.float32),
        grid_spec=pltpu.PrefetchScalarGridSpec(
            num_scalar_prefetch=0,
            grid=(nsteps,),
            in_specs=[
                pl.BlockSpec((tm, D), lambda i: (i, 0)),        # x (streamed)
                pl.BlockSpec((D, 2 * CP), lambda i: (0, 0)),    # fused W (resident)
                pl.BlockSpec((1, 2 * CP), lambda i: (0, 0)),    # fused bias (resident)
                pl.BlockSpec((tm, 1), lambda i: (i, 0)),        # mask column
            ],
            out_specs=pl.BlockSpec((1, 1), lambda i: (0, 0)),   # scalar result
            scratch_shapes=[pltpu.VMEM((1, 1), jnp.float32)],   # running sum
        ),
        compiler_params=pltpu.CompilerParams(
            dimension_semantics=("arbitrary",),                 # reduction axis
            vmem_limit_bytes=vmem_limit),
    )(x2d, w_cat, b_cat, mask_col)
    return out[0, 0]


def _reference(x_nchw, wt, bt, ws, bs, mask):
    # Pure-JAX reference; matmul operands bf16-rounded to match the kernel.
    N = x_nchw.shape[0]
    x2d = x_nchw.reshape(N, -1).astype(jnp.bfloat16).astype(jnp.float32)
    wt = wt.astype(jnp.bfloat16).astype(jnp.float32)
    ws = ws.astype(jnp.bfloat16).astype(jnp.float32)
    lt = x2d @ wt + bt[None, :]
    ls = x2d @ ws + bs[None, :]
    pt = jax.nn.softmax(lt, axis=1)
    ps = jax.nn.softmax(ls, axis=1)
    return jnp.mean(jnp.mean((ps - pt) ** 2, axis=1) * mask)


# TODO(synk): MT.moving_average (EMA parameter update) and global_step
# bookkeeping are host-side parameter management, not part of the forward hot
# path; they are not implemented as kernels here.

def _run_case(key, N, C_in, H, W, num_classes, block_n):
    k_x, k_wt, k_ws, k_bt, k_bs, k_m = jax.random.split(key, 6)
    D = C_in * H * W
    x = jax.random.normal(k_x, (N, C_in, H, W), dtype=jnp.float32)
    w_t = jax.random.normal(k_wt, (D, num_classes), dtype=jnp.float32) * 0.02
    b_t = jax.random.normal(k_bt, (num_classes,), dtype=jnp.float32) * 0.01
    w_s = jax.random.normal(k_ws, (D, num_classes), dtype=jnp.float32) * 0.02
    b_s = jax.random.normal(k_bs, (num_classes,), dtype=jnp.float32) * 0.01
    mask = (jax.random.uniform(k_m, (N,)) > 0.3).astype(jnp.float32)

    loss = mt_forward(x, w_t, b_t, w_s, b_s, mask, block_n=block_n)
    loss = jax.block_until_ready(loss)
    ref = _reference(x, w_t, b_t, w_s, b_s, mask)
    assert jnp.allclose(loss, ref, rtol=1e-2, atol=1e-6), (loss, ref)


if __name__ == "__main__":
    key = jax.random.PRNGKey(0)
    k1, k2 = jax.random.split(key, 2)

    # Small case: N <= tm -> single grid step (no wasted pipeline steps).
    _run_case(k1, N=16, C_in=4, H=16, W=16, num_classes=16, block_n=256)

    # Larger case: N=200 with tm=128 -> 2-step grid, exercises the VMEM
    # accumulator, batch padding and masked (mask=0) padded rows.
    _run_case(k2, N=200, C_in=4, H=16, W=16, num_classes=16, block_n=128)

    print("KERNEL_OK")
</pallas_src>

<mosaic_0001>
module attributes {stable_mosaic.version = 11 : i64} {
  func.func @mt_kernel(%arg0: i32, %arg1: memref<16x1024xf32, #tpu.memory_space<vmem>>, %arg2: memref<1024x256xbf16, #tpu.memory_space<vmem>>, %arg3: memref<1x256xf32, #tpu.memory_space<vmem>>, %arg4: memref<16x1xf32, #tpu.memory_space<vmem>>, %arg5: memref<1x1xf32, #tpu.memory_space<vmem>>, %arg6: memref<1x1xf32, #tpu.memory_space<vmem>>) attributes {dimension_semantics = [#tpu.dimension_semantics<arbitrary>], iteration_bounds = array<i64: 1>, scalar_prefetch = 0 : i64, scratch_operands = 1 : i64, tpu.core_type = #tpu.core_type<tc>, window_params = [{transform_indices = @transform_0, window_bounds = array<i64: 16, 1024>}, {pipeline_mode = #tpu.pipeline_mode<synchronous>, transform_indices = @transform_1, window_bounds = array<i64: 1024, 256>}, {pipeline_mode = #tpu.pipeline_mode<synchronous>, transform_indices = @transform_2, window_bounds = array<i64: 1, 256>}, {transform_indices = @transform_3, window_bounds = array<i64: 16, 1>}, {pipeline_mode = #tpu.pipeline_mode<synchronous>, transform_indices = @transform_4, window_bounds = array<i64: 1, 1>}]} {
    %c0_i32 = arith.constant 0 : i32
    %0 = arith.cmpi eq, %arg0, %c0_i32 : i32
    %1 = arith.extui %0 : i1 to i32
    %c0_i32_0 = arith.constant 0 : i32
    %2 = arith.cmpi ne, %1, %c0_i32_0 : i32
    scf.if %2 {
      %cst_20 = arith.constant 0.000000e+00 : f32
      %49 = vector.broadcast %cst_20 : f32 to vector<1x1xf32>
      %c0_21 = arith.constant 0 : index
      %c0_22 = arith.constant 0 : index
      %50 = vector.load %arg6[%c0_21, %c0_22] : memref<1x1xf32, #tpu.memory_space<vmem>>, vector<1x1xf32>
      tpu.vector_store %arg6[%c0_21, %c0_22], %49 {strides = array<i32>} : memref<1x1xf32, #tpu.memory_space<vmem>>, vector<1x1xf32>,
    } else {
    }
    %c0 = arith.constant 0 : index
    %c0_1 = arith.constant 0 : index
    %3 = vector.load %arg1[%c0, %c0_1] : memref<16x1024xf32, #tpu.memory_space<vmem>>, vector<16x1024xf32>
    %4 = arith.truncf %3 : vector<16x1024xf32> to vector<16x1024xbf16>
    %c0_2 = arith.constant 0 : index
    %c0_3 = arith.constant 0 : index
    %5 = vector.load %arg2[%c0_2, %c0_3] : memref<1024x256xbf16, #tpu.memory_space<vmem>>, vector<1024x256xbf16>
    %cst = arith.constant dense<0.000000e+00> : vector<16x256xf32>
    %6 = tpu.matmul %4, %5, %cst {dimension_numbers = #tpu.dot_dimension_numbers<[1], [0], [0], [1], [0, 0, 1, 1], [], []>} : vector<16x1024xbf16>, vector<1024x256xbf16>, vector<16x256xf32> -> vector<16x256xf32>
    %c0_4 = arith.constant 0 : index
    %c0_5 = arith.constant 0 : index
    %7 = vector.load %arg3[%c0_4, %c0_5] : memref<1x256xf32, #tpu.memory_space<vmem>>, vector<1x256xf32>
    %8 = vector.broadcast %7 : vector<1x256xf32> to vector<16x256xf32>
    %9 = arith.addf %6, %8 : vector<16x256xf32>
    %10 = vector.extract_strided_slice %9 {offsets = [0, 0], sizes = [16, 128], strides = [1, 1]} : vector<16x256xf32> to vector<16x128xf32>
    %11 = vector.extract_strided_slice %9 {offsets = [0, 128], sizes = [16, 128], strides = [1, 1]} : vector<16x256xf32> to vector<16x128xf32>
    %cst_6 = arith.constant dense<0xFF800000> : vector<16xf32>
    %12 = vector.multi_reduction <maximumf>, %10, %cst_6 [1] : vector<16x128xf32> to vector<16xf32>
    %13 = vector.shape_cast %12 : vector<16xf32> to vector<16x1xf32>
    %14 = vector.broadcast %13 : vector<16x1xf32> to vector<16x128xf32>
    %15 = arith.subf %10, %14 : vector<16x128xf32>
    %16 = math.exp %15 : vector<16x128xf32>
    %cst_7 = arith.constant dense<0.000000e+00> : vector<16xf32>
    %17 = vector.multi_reduction <add>, %16, %cst_7 [1] : vector<16x128xf32> to vector<16xf32>
    %18 = vector.shape_cast %17 : vector<16xf32> to vector<16x1xf32>
    %19 = tpu.reciprocal %18 {approx = true} : vector<16x1xf32> -> vector<16x1xf32>
    %20 = vector.broadcast %19 : vector<16x1xf32> to vector<16x128xf32>
    %21 = arith.mulf %16, %20 : vector<16x128xf32>
    %cst_8 = arith.constant dense<0xFF800000> : vector<16xf32>
    %22 = vector.multi_reduction <maximumf>, %11, %cst_8 [1] : vector<16x128xf32> to vector<16xf32>
    %23 = vector.shape_cast %22 : vector<16xf32> to vector<16x1xf32>
    %24 = vector.broadcast %23 : vector<16x1xf32> to vector<16x128xf32>
    %25 = arith.subf %11, %24 : vector<16x128xf32>
    %26 = math.exp %25 : vector<16x128xf32>
    %cst_9 = arith.constant dense<0.000000e+00> : vector<16xf32>
    %27 = vector.multi_reduction <add>, %26, %cst_9 [1] : vector<16x128xf32> to vector<16xf32>
    %28 = vector.shape_cast %27 : vector<16xf32> to vector<16x1xf32>
    %29 = tpu.reciprocal %28 {approx = true} : vector<16x1xf32> -> vector<16x1xf32>
    %30 = vector.broadcast %29 : vector<16x1xf32> to vector<16x128xf32>
    %31 = arith.mulf %26, %30 : vector<16x128xf32>
    %32 = arith.subf %31, %21 : vector<16x128xf32>
    %33 = arith.mulf %32, %32 : vector<16x128xf32>
    %cst_10 = arith.constant dense<0.000000e+00> : vector<16xf32>
    %34 = vector.multi_reduction <add>, %33, %cst_10 [1] : vector<16x128xf32> to vector<16xf32>
    %35 = vector.shape_cast %34 : vector<16xf32> to vector<16x1xf32>
    %c0_11 = arith.constant 0 : index
    %c0_12 = arith.constant 0 : index
    %36 = vector.load %arg4[%c0_11, %c0_12] : memref<16x1xf32, #tpu.memory_space<vmem>>, vector<16x1xf32>
    %37 = arith.mulf %35, %36 : vector<16x1xf32>
    %c0_13 = arith.constant 0 : index
    %c0_14 = arith.constant 0 : index
    %38 = vector.load %arg6[%c0_13, %c0_14] : memref<1x1xf32, #tpu.memory_space<vmem>>, vector<1x1xf32>
    %39 = vector.shape_cast %37 : vector<16x1xf32> to vector<1x16x1xf32>
    %cst_15 = arith.constant dense<0.000000e+00> : vector<1xf32>
    %40 = vector.multi_reduction <add>, %39, %cst_15 [1, 2] : vector<1x16x1xf32> to vector<1xf32>
    %41 = vector.shape_cast %40 : vector<1xf32> to vector<1x1x1xf32>
    %42 = vector.extract %41[0, 0, 0] : f32 from vector<1x1x1xf32>
    %43 = vector.broadcast %42 : f32 to vector<1x1xf32>
    %44 = arith.addf %38, %43 : vector<1x1xf32>
    %c0_16 = arith.constant 0 : index
    %c0_17 = arith.constant 0 : index
    %45 = vector.load %arg6[%c0_16, %c0_17] : memref<1x1xf32, #tpu.memory_space<vmem>>, vector<1x1xf32>
    tpu.vector_store %arg6[%c0_16, %c0_17], %44 {strides = array<i32>} : memref<1x1xf32, #tpu.memory_space<vmem>>, vector<1x1xf32>,
    %c0_i32_18 = arith.constant 0 : i32
    %46 = arith.cmpi eq, %arg0, %c0_i32_18 : i32
    %47 = arith.extui %46 : i1 to i32
    %c0_i32_19 = arith.constant 0 : i32
    %48 = arith.cmpi ne, %47, %c0_i32_19 : i32
    scf.if %48 {
      %c0_20 = arith.constant 0 : index
      %c0_21 = arith.constant 0 : index
      %49 = vector.load %arg6[%c0_20, %c0_21] : memref<1x1xf32, #tpu.memory_space<vmem>>, vector<1x1xf32>
      %cst_22 = arith.constant 3.906250e-03 : f32
      %50 = vector.broadcast %cst_22 : f32 to vector<1x1xf32>
      %51 = arith.mulf %49, %50 : vector<1x1xf32>
      %c0_23 = arith.constant 0 : index
      %c0_24 = arith.constant 0 : index
      %52 = vector.load %arg5[%c0_23, %c0_24] : memref<1x1xf32, #tpu.memory_space<vmem>>, vector<1x1xf32>
      tpu.vector_store %arg5[%c0_23, %c0_24], %51 {strides = array<i32>} : memref<1x1xf32, #tpu.memory_space<vmem>>, vector<1x1xf32>,
    } else {
    }
    return
  }
  func.func @transform_0(%arg0: i32) -> (i32, i32) {
    %c0_i32 = arith.constant 0 : i32
    %c0_i32_0 = arith.constant 0 : i32
    return %arg0, %c0_i32 : i32, i32
  }
  func.func @transform_1(%arg0: i32) -> (i32, i32) {
    %c0_i32 = arith.constant 0 : i32
    %c0_i32_0 = arith.constant 0 : i32
    %c0_i32_1 = arith.constant 0 : i32
    return %c0_i32, %c0_i32_0 : i32, i32
  }
  func.func @transform_2(%arg0: i32) -> (i32, i32) {
    %c0_i32 = arith.constant 0 : i32
    %c0_i32_0 = arith.constant 0 : i32
    %c0_i32_1 = arith.constant 0 : i32
    return %c0_i32, %c0_i32_0 : i32, i32
  }
  func.func @transform_3(%arg0: i32) -> (i32, i32) {
    %c0_i32 = arith.constant 0 : i32
    %c0_i32_0 = arith.constant 0 : i32
    return %arg0, %c0_i32 : i32, i32
  }
  func.func @transform_4(%arg0: i32) -> (i32, i32) {
    %c0_i32 = arith.constant 0 : i32
    %c0_i32_0 = arith.constant 0 : i32
    %c0_i32_1 = arith.constant 0 : i32
    return %c0_i32, %c0_i32_0 : i32, i32
  }
}

</mosaic_0001>

<bundles_post_ra>
// kernel: tpu_custom_call.1
= control target key start
LH: loop header
LB: loop body
LE: loop exit
PB: predicated region body
PF: predicated region fallthrough
CT: control target
= control target key end

     0   :  { %9 = vsyncpa [#allocation4], 0  ;;  %s1998_s0 = inlined_call_operand.hbm [shape: f32[16,1024], index: 0, kind: input, shape index: {}]   ;;  %s1999_s1 = inlined_call_operand.hbm [shape: bf16[1024,256], index: 1, kind: input, shape index: {}]   ;;  %s2000_s2 = inlined_call_operand.vmem [shape: f32[1,256], index: 2, kind: input, shape index: {}]   ;;  %s2001_s3 = inlined_call_operand.vmem [shape: f32[16,1], index: 3, kind: input, shape index: {}]   ;;  %s2002_s4 = inlined_call_operand.hbm [shape: f32[1,1], index: 4, kind: output, shape index: {}]  }
   0x1   :  { %10 = vsyncpa [#allocation7], 0 }
   0x2   :  { %11 = vsyncpa [#allocation5], 0  ;;  %s16_s17 = sshll.u32 %s1998_s0, 4  ;;  %s1912_s18 = smov [#allocation3]   ;;  %s17_s17 = int_to_ptr.hbm [resolvable:$true] %s16_s17 }
   0x3   :  { %s18_s19 = sshll.u32 %s1912_s18, 4  ;;  %s29_s22 = sshll.u32 %s1999_s1, 4  ;;  %s19_s19 = int_to_ptr.vmem [resolvable:$true] %s18_s19  ;;  %s30_s22 = int_to_ptr.hbm [resolvable:$true] %s29_s22 }
   0x4   :  { %s1913_s23 = smov 1024   ;;  %s1914_s24 = smov 64  }
   0x5   :  { %24 = dma.hbm_to_vmem [thread:$0]  %s17_s17, 2048, %s19_s19, [#allocation4], %s1913_s23, %s1913_s23, %s1914_s24  }
   0x6   :  { %s1915_s25 = smov [#allocation6]   ;;  %s1916_s27 = smov 128  }
   0x7   :  { %s31_s26 = sshll.u32 %s1915_s25, 4  ;;  %s1917_s28 = smov 8   ;;  %s32_s26 = int_to_ptr.vmem [resolvable:$true] %s31_s26 }
   0x8   :  { %37 = dma.hbm_to_vmem [thread:$0]  %s30_s22, 16384, %s32_s26, [#allocation7], %s1916_s27, %s1916_s27, %s1917_s28  }
   0x9   :  { %1906 = dma.done.wait [#allocation4], 2048  }
   0xa   :  { %1907 = vsyncadd [#allocation4], 4294965248 }
   0xb   :  { %1908 = dma.done.wait [#allocation7], 16384  }
   0xc   :  { %1909 = vsyncadd [#allocation7], 4294950912  ;;  %v1226_v0 = vld [vmem:[#allocation6 + $0x70] sm:$0xf]  ;;  %v1695_v1 = vld [vmem:[#allocation6 + $0x74] sm:$0xf0] }
   0xd   :  { %v1290_v2 = vld [vmem:[#allocation6 + $0xf0] sm:$0xf]  ;;  %v1227_v3 = vor.u32 %v1695_v1, %v1226_v0  ;;  %v1711_v4 = vld [vmem:[#allocation6 + $0xf4] sm:$0xf0]  ;;  %v1218_v11 = vld [vmem:[#allocation6 + $0x60] sm:$0xf] }
   0xe   :  { %v1354_v5 = vld [vmem:[#allocation6 + $0x170] sm:$0xf]  ;;  %v1727_v6 = vld [vmem:[#allocation6 + $0x174] sm:$0xf0]  ;;  %v1291_v7 = vor.u32 %v1711_v4, %v1290_v2  ;;  %v1693_v13 = vld [vmem:[#allocation6 + $0x64] sm:$0xf0] }
   0xf   :  { %v1355_v8 = vor.u32 %v1727_v6, %v1354_v5  ;;  %v1418_v9 = vld [vmem:[#allocation6 + $0x1f0] sm:$0xf]  ;;  %v1743_v10 = vld [vmem:[#allocation6 + $0x1f4] sm:$0xf0]  ;;  %854 = vmatpush.bf16.msra.mxu0 %v1227_v3  ;;  %v1282_v14 = vld [vmem:[#allocation6 + $0xe0] sm:$0xf]  ;;  %v1219_v16 = vor.u32 %v1693_v13, %v1218_v11 }
  0x10   :  { %v1419_v12 = vor.u32 %v1743_v10, %v1418_v9  ;;  %v1709_v15 = vld [vmem:[#allocation6 + $0xe4] sm:$0xf0]  ;;  %868 = vmatpush.bf16.msra.mxu1 %v1291_v7  ;;  %v1346_v18 = vld [vmem:[#allocation6 + $0x160] sm:$0xf]  ;;  %v1210_v23 = vld [vmem:[#allocation6 + $0x50] sm:$0xf] }
  0x11   :  { %882 = vmatpush.bf16.msra.mxu2 %v1355_v8  ;;  %v1283_v17 = vor.u32 %v1709_v15, %v1282_v14  ;;  %v1725_v19 = vld [vmem:[#allocation6 + $0x164] sm:$0xf0]  ;;  %v1410_v20 = vld [vmem:[#allocation6 + $0x1e0] sm:$0xf]  ;;  %v1691_v24 = vld [vmem:[#allocation6 + $0x54] sm:$0xf0] }
  0x12   :  { %896 = vmatpush.bf16.msra.mxu3 %v1419_v12  ;;  %v1347_v21 = vor.u32 %v1725_v19, %v1346_v18  ;;  %v1741_v22 = vld [vmem:[#allocation6 + $0x1e4] sm:$0xf0]  ;;  %v1274_v26 = vld [vmem:[#allocation6 + $0xd0] sm:$0xf]  ;;  %v1707_v27 = vld [vmem:[#allocation6 + $0xd4] sm:$0xf0]  ;;  %v1211_v29 = vor.u32 %v1691_v24, %v1210_v23 }
  0x13   :  { %v1411_v25 = vor.u32 %v1741_v22, %v1410_v20  ;;  %v1338_v28 = vld [vmem:[#allocation6 + $0x150] sm:$0xf]  ;;  %855 = vmatpush.bf16.msra.mxu0 %v1219_v16  ;;  %v1723_v30 = vld [vmem:[#allocation6 + $0x154] sm:$0xf0]  ;;  %v1275_v33 = vor.u32 %v1707_v27, %v1274_v26  ;;  %v1202_v35 = vld [vmem:[#allocation6 + $0x40] sm:$0xf] }
  0x14   :  { %v1402_v31 = vld [vmem:[#allocation6 + $0x1d0] sm:$0xf]  ;;  %v1739_v32 = vld [vmem:[#allocation6 + $0x1d4] sm:$0xf0]  ;;  %869 = vmatpush.bf16.msra.mxu1 %v1283_v17  ;;  %v1339_v34 = vor.u32 %v1723_v30, %v1338_v28  ;;  %v1689_v36 = vld [vmem:[#allocation6 + $0x44] sm:$0xf0] }
  0x15   :  { %883 = vmatpush.bf16.msra.mxu2 %v1347_v21  ;;  %v1266_v37 = vld [vmem:[#allocation6 + $0xc0] sm:$0xf]  ;;  %v1403_v38 = vor.u32 %v1739_v32, %v1402_v31  ;;  %v1705_v39 = vld [vmem:[#allocation6 + $0xc4] sm:$0xf0]  ;;  %v1203_v44 = vor.u32 %v1689_v36, %v1202_v35  ;;  %v1194_v47 = vld [vmem:[#allocation6 + $0x30] sm:$0xf] }
  0x16   :  { %897 = vmatpush.bf16.msra.mxu3 %v1411_v25  ;;  %v1330_v40 = vld [vmem:[#allocation6 + $0x140] sm:$0xf]  ;;  %v1721_v41 = vld [vmem:[#allocation6 + $0x144] sm:$0xf0]  ;;  %v1267_v45 = vor.u32 %v1705_v39, %v1266_v37  ;;  %v1687_v48 = vld [vmem:[#allocation6 + $0x34] sm:$0xf0] }
  0x17   :  { %v1394_v42 = vld [vmem:[#allocation6 + $0x1c0] sm:$0xf]  ;;  %v1737_v43 = vld [vmem:[#allocation6 + $0x1c4] sm:$0xf0]  ;;  %856 = vmatpush.bf16.msra.mxu0 %v1211_v29  ;;  %v1331_v46 = vor.u32 %v1721_v41, %v1330_v40  ;;  %v1258_v49 = vld [vmem:[#allocation6 + $0xb0] sm:$0xf]  ;;  %v1195_v56 = vor.u32 %v1687_v48, %v1194_v47 }
  0x18   :  { %870 = vmatpush.bf16.msra.mxu1 %v1275_v33  ;;  %v1395_v50 = vor.u32 %v1737_v43, %v1394_v42  ;;  %v1703_v51 = vld [vmem:[#allocation6 + $0xb4] sm:$0xf0]  ;;  %v1322_v52 = vld [vmem:[#allocation6 + $0x130] sm:$0xf]  ;;  %v1186_v59 = vld [vmem:[#allocation6 + $0x20] sm:$0xf] }
  0x19   :  { %884 = vmatpush.bf16.msra.mxu2 %v1339_v34  ;;  %v1719_v53 = vld [vmem:[#allocation6 + $0x134] sm:$0xf0]  ;;  %v1386_v54 = vld [vmem:[#allocation6 + $0x1b0] sm:$0xf]  ;;  %v1259_v57 = vor.u32 %v1703_v51, %v1258_v49  ;;  %v1685_v60 = vld [vmem:[#allocation6 + $0x24] sm:$0xf0] }
  0x1a   :  { %898 = vmatpush.bf16.msra.mxu3 %v1403_v38  ;;  %v1735_v55 = vld [vmem:[#allocation6 + $0x1b4] sm:$0xf0]  ;;  %v1323_v58 = vor.u32 %v1719_v53, %v1322_v52  ;;  %v1250_v61 = vld [vmem:[#allocation6 + $0xa0] sm:$0xf]  ;;  %v1701_v63 = vld [vmem:[#allocation6 + $0xa4] sm:$0xf0]  ;;  %v1187_v4 = vor.u32 %v1685_v60, %v1186_v59 }
  0x1b   :  { %857 = vmatpush.bf16.msra.mxu0 %v1203_v44  ;;  %v1387_v62 = vor.u32 %v1735_v55, %v1386_v54  ;;  %v1314_v0 = vld [vmem:[#allocation6 + $0x120] sm:$0xf]  ;;  %v1717_v1 = vld [vmem:[#allocation6 + $0x124] sm:$0xf0]  ;;  %v1251_v5 = vor.u32 %v1701_v63, %v1250_v61  ;;  %v1178_v7 = vld [vmem:[#allocation6 + $0x10] sm:$0xf] }
  0x1c   :  { %871 = vmatpush.bf16.msra.mxu1 %v1267_v45  ;;  %v1378_v2 = vld [vmem:[#allocation6 + $0x1a0] sm:$0xf]  ;;  %v1733_v3 = vld [vmem:[#allocation6 + $0x1a4] sm:$0xf0]  ;;  %v1315_v6 = vor.u32 %v1717_v1, %v1314_v0  ;;  %v1683_v8 = vld [vmem:[#allocation6 + $0x14] sm:$0xf0] }
  0x1d   :  { %885 = vmatpush.bf16.msra.mxu2 %v1331_v46  ;;  %v1242_v9 = vld [vmem:[#allocation6 + $0x90] sm:$0xf]  ;;  %v1379_v10 = vor.u32 %v1733_v3, %v1378_v2  ;;  %v1699_v11 = vld [vmem:[#allocation6 + $0x94] sm:$0xf0]  ;;  %v1179_v16 = vor.u32 %v1683_v8, %v1178_v7  ;;  %v1170_v17 = vld [vmem:[#allocation6] sm:$0xf] }
  0x1e   :  { %899 = vmatpush.bf16.msra.mxu3 %v1395_v50  ;;  %v1306_v12 = vld [vmem:[#allocation6 + $0x110] sm:$0xf]  ;;  %v1715_v13 = vld [vmem:[#allocation6 + $0x114] sm:$0xf0]  ;;  %v1681_v18 = vld [vmem:[#allocation6 + $0x4] sm:$0xf0]  ;;  %v1243_v19 = vor.u32 %v1699_v11, %v1242_v9 }
  0x1f   :  { %858 = vmatpush.bf16.msra.mxu0 %v1195_v56  ;;  %v1370_v14 = vld [vmem:[#allocation6 + $0x190] sm:$0xf]  ;;  %v1731_v15 = vld [vmem:[#allocation6 + $0x194] sm:$0xf0]  ;;  %v1307_v20 = vor.u32 %v1715_v13, %v1306_v12  ;;  %v1234_v21 = vld [vmem:[#allocation6 + $0x80] sm:$0xf]  ;;  %v1171_v31 = vor.u32 %v1681_v18, %v1170_v17 }
  0x20   :  { %872 = vmatpush.bf16.msra.mxu1 %v1259_v57  ;;  %v1697_v22 = vld [vmem:[#allocation6 + $0x84] sm:$0xf0]  ;;  %v1298_v23 = vld [vmem:[#allocation6 + $0x100] sm:$0xf]  ;;  %v1371_v24 = vor.u32 %v1731_v15, %v1370_v14  ;;  %v1482_v28 = vld [vmem:[#allocation6 + $0x270] sm:$0xf] }
  0x21   :  { %886 = vmatpush.bf16.msra.mxu2 %v1323_v58  ;;  %v1713_v25 = vld [vmem:[#allocation6 + $0x104] sm:$0xf0]  ;;  %v1362_v26 = vld [vmem:[#allocation6 + $0x180] sm:$0xf]  ;;  %v1759_v29 = vld [vmem:[#allocation6 + $0x274] sm:$0xf0]  ;;  %v1235_v35 = vor.u32 %v1697_v22, %v1234_v21 }
  0x22   :  { %900 = vmatpush.bf16.msra.mxu3 %v1387_v62  ;;  %v1729_v27 = vld [vmem:[#allocation6 + $0x184] sm:$0xf0]  ;;  %v1546_v30 = vld [vmem:[#allocation6 + $0x2f0] sm:$0xf]  ;;  %v1775_v32 = vld [vmem:[#allocation6 + $0x2f4] sm:$0xf0]  ;;  %v1299_v36 = vor.u32 %v1713_v25, %v1298_v23  ;;  %v1483_v40 = vor.u32 %v1759_v29, %v1482_v28 }
  0x23   :  { %859 = vmatpush.bf16.msra.mxu0 %v1187_v4  ;;  %v1610_v33 = vld [vmem:[#allocation6 + $0x370] sm:$0xf]  ;;  %v1791_v34 = vld [vmem:[#allocation6 + $0x374] sm:$0xf0]  ;;  %v1363_v39 = vor.u32 %v1729_v27, %v1362_v26  ;;  %v1474_v41 = vld [vmem:[#allocation6 + $0x260] sm:$0xf]  ;;  %v1547_v43 = vor.u32 %v1775_v32, %v1546_v30 }
  0x24   :  { %873 = vmatpush.bf16.msra.mxu1 %v1251_v5  ;;  %v1674_v37 = vld [vmem:[#allocation6 + $0x3f0] sm:$0xf]  ;;  %v1807_v38 = vld [vmem:[#allocation6 + $0x3f4] sm:$0xf0]  ;;  %v1757_v42 = vld [vmem:[#allocation6 + $0x264] sm:$0xf0]  ;;  %v1611_v44 = vor.u32 %v1791_v34, %v1610_v33 }
  0x25   :  { %887 = vmatpush.bf16.msra.mxu2 %v1315_v6  ;;  %v1538_v45 = vld [vmem:[#allocation6 + $0x2e0] sm:$0xf]  ;;  %v1773_v46 = vld [vmem:[#allocation6 + $0x2e4] sm:$0xf0]  ;;  %v1675_v48 = vor.u32 %v1807_v38, %v1674_v37  ;;  %v58_v54 = vld [vmem:[#allocation3 + $0x10] sm:$0xff]  ;;  %v1475_v55 = vor.u32 %v1757_v42, %v1474_v41  ;;  %vm1127_vm0 = vcmask 7168  }
  0x26   :  { %901 = vmatpush.bf16.msra.mxu3 %v1379_v10  ;;  %v1602_v47 = vld [vmem:[#allocation6 + $0x360] sm:$0xf]  ;;  %v1789_v49 = vld [vmem:[#allocation6 + $0x364] sm:$0xf0]  ;;  %v1466_v56 = vld [vmem:[#allocation6 + $0x250] sm:$0xf]  ;;  %v1539_v60 = vor.u32 %v1773_v46, %v1538_v45 }
  0x27   :  { %860 = vmatpush.bf16.msra.mxu0 %v1179_v16  ;;  %v1666_v50 = vld [vmem:[#allocation6 + $0x3e0] sm:$0xf]  ;;  %v1805_v51 = vld [vmem:[#allocation6 + $0x3e4] sm:$0xf0]  ;;  %v1755_v57 = vld [vmem:[#allocation6 + $0x254] sm:$0xf0]  ;;  %v1603_v61 = vor.u32 %v1789_v49, %v1602_v47 }
  0x28   :  { %874 = vmatpush.bf16.msra.mxu1 %v1243_v19  ;;  %v56_v52 = vld [vmem:[#allocation3] sm:$0xff]  ;;  %v66_v59 = vld [vmem:[#allocation3 + $0x50] sm:$0xff]  ;;  %v1771_v63 = vld [vmem:[#allocation6 + $0x2d4] sm:$0xf0]  ;;  %v1667_v2 = vor.u32 %v1805_v51, %v1666_v50  ;;  %v1467_v9 = vor.u32 %v1755_v57, %v1466_v56  ;;  %vm54_vm1 = vcmask 0   ;;  %s1919_s6 = smov [#allocation8]  }
  0x29   :  { %888 = vmatpush.bf16.msra.mxu2 %v1307_v20  ;;  %v64_v53 = vld [vmem:[#allocation3 + $0x40] sm:$0xff]  ;;  %v1530_v62 = vld [vmem:[#allocation6 + $0x2d0] sm:$0xf]  ;;  %v1953_v1 = vpack.c.bf16 %v66_v59, %v58_v54  ;;  %v1787_v3 = vld [vmem:[#allocation6 + $0x354] sm:$0xf0]  ;;  %s1155_s7 = sshll.u32 %s1919_s6, 4  ;;  %s1156_s7 = int_to_ptr.vmem [resolvable:$true] %s1155_s7 }
  0x2a   :  { %902 = vmatpush.bf16.msra.mxu3 %v1371_v24  ;;  %v1951_v58 = vpack.c.bf16 %v64_v53, %v56_v52  ;;  %v1594_v0 = vld [vmem:[#allocation6 + $0x350] sm:$0xf]  ;;  %v1803_v5 = vld [vmem:[#allocation6 + $0x3d4] sm:$0xf0]  ;;  %v57_v6 = vld [vmem:[#allocation3 + $0x8] sm:$0xff]  ;;  %v1531_v12 = vor.u32 %v1771_v63, %v1530_v62  ;;  %s1157_s10 = sshll.u32 %s2002_s4, 4  ;;  %s1158_s10 = int_to_ptr.hbm [resolvable:$true] %s1157_s10 }
  0x2b   :  { %861 = vmatpush.bf16.msra.mxu0 %v1171_v31  ;;  %v1658_v4 = vld [vmem:[#allocation6 + $0x3d0] sm:$0xf]  ;;  %v65_v7 = vld [vmem:[#allocation3 + $0x48] sm:$0xff]  ;;  %v59_v8 = vld [vmem:[#allocation3 + $0x18] sm:$0xff]  ;;  %v1595_v13 = vor.u32 %v1787_v3, %v1594_v0 }
  0x2c   :  { %875 = vmatpush.bf16.msra.mxu1 %v1235_v35  ;;  %v1957_v10 = vpack.c.bf16 %v65_v7, %v57_v6  ;;  %v67_v11 = vld [vmem:[#allocation3 + $0x58] sm:$0xff]  ;;  %v1458_v14 = vld [vmem:[#allocation6 + $0x240] sm:$0xf]  ;;  %v1753_v15 = vld [vmem:[#allocation6 + $0x244] sm:$0xf0]  ;;  %v1659_v18 = vor.u32 %v1803_v5, %v1658_v4 }
  0x2d   :  { %889 = vmatpush.bf16.msra.mxu2 %v1299_v36  ;;  %v1522_v16 = vld [vmem:[#allocation6 + $0x2c0] sm:$0xf]  ;;  %v1959_v17 = vpack.c.bf16 %v67_v11, %v59_v8  ;;  %v1769_v19 = vld [vmem:[#allocation6 + $0x2c4] sm:$0xf0]  ;;  %v1459_v24 = vor.u32 %v1753_v15, %v1458_v14  ;;  %v1450_v27 = vld [vmem:[#allocation6 + $0x230] sm:$0xf] }
  0x2e   :  { %903 = vmatpush.bf16.msra.mxu3 %v1363_v39  ;;  %862 = vmatmul.bf16.vlgmr.msra.gmra.mxu0 %v1951_v58  ;;  %v1586_v20 = vld [vmem:[#allocation6 + $0x340] sm:$0xf]  ;;  %v1785_v21 = vld [vmem:[#allocation6 + $0x344] sm:$0xf0]  ;;  %v1523_v25 = vor.u32 %v1769_v19, %v1522_v16  ;;  %v1751_v28 = vld [vmem:[#allocation6 + $0x234] sm:$0xf0] }
  0x2f   :  { %910 = vmatpush.bf16.msrb.mxu0 %v1483_v40  ;;  %876 = vmatmul.bf16.vlgmr.msra.gmra.mxu1 %v1957_v10  ;;  %v1650_v22 = vld [vmem:[#allocation6 + $0x3c0] sm:$0xf]  ;;  %v1801_v23 = vld [vmem:[#allocation6 + $0x3c4] sm:$0xf0]  ;;  %v1587_v26 = vor.u32 %v1785_v21, %v1586_v20  ;;  %v1514_v29 = vld [vmem:[#allocation6 + $0x2b0] sm:$0xf]  ;;  %v1451_v36 = vor.u32 %v1751_v28, %v1450_v27 }
  0x30   :  { %924 = vmatpush.bf16.msrb.mxu1 %v1547_v43  ;;  %890 = vmatmul.bf16.vlgmr.msra.gmra.mxu2 %v1953_v1  ;;  %v1651_v30 = vor.u32 %v1801_v23, %v1650_v22  ;;  %v1767_v31 = vld [vmem:[#allocation6 + $0x2b4] sm:$0xf0]  ;;  %v1578_v32 = vld [vmem:[#allocation6 + $0x330] sm:$0xf]  ;;  %v1442_v39 = vld [vmem:[#allocation6 + $0x220] sm:$0xf] }
  0x31   :  { %938 = vmatpush.bf16.msrb.mxu2 %v1611_v44  ;;  %904 = vmatmul.bf16.vlgmr.msra.gmra.mxu3 %v1959_v17  ;;  %v1783_v33 = vld [vmem:[#allocation6 + $0x334] sm:$0xf0]  ;;  %v1642_v34 = vld [vmem:[#allocation6 + $0x3b0] sm:$0xf]  ;;  %v1515_v37 = vor.u32 %v1767_v31, %v1514_v29  ;;  %v1749_v40 = vld [vmem:[#allocation6 + $0x224] sm:$0xf0] }
  0x32   :  { %952 = vmatpush.bf16.msrb.mxu3 %v1675_v48  ;;  %v1799_v35 = vld [vmem:[#allocation6 + $0x3b4] sm:$0xf0]  ;;  %v1579_v38 = vor.u32 %v1783_v33, %v1578_v32  ;;  %v1506_v41 = vld [vmem:[#allocation6 + $0x2a0] sm:$0xf]  ;;  %v1765_v43 = vld [vmem:[#allocation6 + $0x2a4] sm:$0xf0]  ;;  %v1443_v48 = vor.u32 %v1749_v40, %v1442_v39 }
  0x33   :  { %911 = vmatpush.bf16.msrb.mxu0 %v1475_v55  ;;  %v1643_v42 = vor.u32 %v1799_v35, %v1642_v34  ;;  %v1570_v44 = vld [vmem:[#allocation6 + $0x320] sm:$0xf]  ;;  %v1781_v45 = vld [vmem:[#allocation6 + $0x324] sm:$0xf0]  ;;  %v1434_v49 = vld [vmem:[#allocation6 + $0x210] sm:$0xf]  ;;  %v1507_v50 = vor.u32 %v1765_v43, %v1506_v41 }
  0x34   :  { %925 = vmatpush.bf16.msrb.mxu1 %v1539_v60  ;;  %v1634_v46 = vld [vmem:[#allocation6 + $0x3a0] sm:$0xf]  ;;  %v1797_v47 = vld [vmem:[#allocation6 + $0x3a4] sm:$0xf0]  ;;  %v1571_v51 = vor.u32 %v1781_v45, %v1570_v44  ;;  %v1747_v52 = vld [vmem:[#allocation6 + $0x214] sm:$0xf0] }
  0x35   :  { %939 = vmatpush.bf16.msrb.mxu2 %v1603_v61  ;;  %v1498_v53 = vld [vmem:[#allocation6 + $0x290] sm:$0xf]  ;;  %v1763_v54 = vld [vmem:[#allocation6 + $0x294] sm:$0xf0]  ;;  %v1635_v55 = vor.u32 %v1797_v47, %v1634_v46  ;;  %v1426_v61 = vld [vmem:[#allocation6 + $0x200] sm:$0xf]  ;;  %v1435_v63 = vor.u32 %v1747_v52, %v1434_v49 }
  0x36   :  { %953 = vmatpush.bf16.msrb.mxu3 %v1667_v2  ;;  %v1562_v56 = vld [vmem:[#allocation6 + $0x310] sm:$0xf]  ;;  %v1779_v57 = vld [vmem:[#allocation6 + $0x314] sm:$0xf0]  ;;  %v1745_v62 = vld [vmem:[#allocation6 + $0x204] sm:$0xf0]  ;;  %v1499_v5 = vor.u32 %v1763_v54, %v1498_v53 }
  0x37   :  { %912 = vmatpush.bf16.msrb.mxu0 %v1467_v9  ;;  %v1626_v59 = vld [vmem:[#allocation6 + $0x390] sm:$0xf]  ;;  %v1795_v60 = vld [vmem:[#allocation6 + $0x394] sm:$0xf0]  ;;  %v1490_v0 = vld [vmem:[#allocation6 + $0x280] sm:$0xf]  ;;  %v1563_v6 = vor.u32 %v1779_v57, %v1562_v56  ;;  %v1427_v19 = vor.u32 %v1745_v62, %v1426_v61 }
  0x38   :  { %926 = vmatpush.bf16.msrb.mxu1 %v1531_v12  ;;  %v1761_v2 = vld [vmem:[#allocation6 + $0x284] sm:$0xf0]  ;;  %v1554_v3 = vld [vmem:[#allocation6 + $0x300] sm:$0xf]  ;;  %v1694_v9 = vld [vmem:[#allocation6 + $0x74] sm:$0xf]  ;;  %v1627_v11 = vor.u32 %v1795_v60, %v1626_v59 }
  0x39   :  { %940 = vmatpush.bf16.msrb.mxu2 %v1595_v13  ;;  %v1777_v4 = vld [vmem:[#allocation6 + $0x304] sm:$0xf0]  ;;  %v1618_v7 = vld [vmem:[#allocation6 + $0x380] sm:$0xf]  ;;  %v1228_v12 = vld [vmem:[#allocation6 + $0x78] sm:$0xf0]  ;;  %v1491_v23 = vor.u32 %v1761_v2, %v1490_v0 }
  0x3a   :  { %954 = vmatpush.bf16.msrb.mxu3 %v1659_v18  ;;  %v1793_v8 = vld [vmem:[#allocation6 + $0x384] sm:$0xf0]  ;;  %v1710_v13 = vld [vmem:[#allocation6 + $0xf4] sm:$0xf]  ;;  %v1292_v14 = vld [vmem:[#allocation6 + $0xf8] sm:$0xf0]  ;;  %v1231_v29 = vor.u32 %v1694_v9, %v1228_v12 }
  0x3b   :  { %913 = vmatpush.bf16.msrb.mxu0 %v1459_v24  ;;  %v1726_v15 = vld [vmem:[#allocation6 + $0x174] sm:$0xf]  ;;  %v1356_v16 = vld [vmem:[#allocation6 + $0x178] sm:$0xf0]  ;;  %v60_v21 = vld [vmem:[#allocation3 + $0x20] sm:$0xff]  ;;  %v1555_v24 = vor.u32 %v1777_v4, %v1554_v3  ;;  %v1619_v28 = vor.u32 %v1793_v8, %v1618_v7  ;;  %v1295_v33 = vor.u32 %v1710_v13, %v1292_v14 }
  0x3c   :  { %927 = vmatpush.bf16.msrb.mxu1 %v1523_v25  ;;  %v1742_v18 = vld [vmem:[#allocation6 + $0x1f4] sm:$0xf]  ;;  %v1420_v20 = vld [vmem:[#allocation6 + $0x1f8] sm:$0xf0]  ;;  %v68_v22 = vld [vmem:[#allocation3 + $0x60] sm:$0xff]  ;;  %v1359_v34 = vor.u32 %v1726_v15, %v1356_v16 }
  0x3d   :  { %941 = vmatpush.bf16.msrb.mxu2 %v1587_v26  ;;  %v62_v25 = vld [vmem:[#allocation3 + $0x30] sm:$0xff]  ;;  %v61_v27 = vld [vmem:[#allocation3 + $0x28] sm:$0xff]  ;;  %v63_v31 = vld [vmem:[#allocation3 + $0x38] sm:$0xff]  ;;  %v1963_v39 = vpack.c.bf16 %v68_v22, %v60_v21 }
  0x3e   :  { %955 = vmatpush.bf16.msrb.mxu3 %v1651_v30  ;;  %v70_v26 = vld [vmem:[#allocation3 + $0x70] sm:$0xff]  ;;  %v69_v30 = vld [vmem:[#allocation3 + $0x68] sm:$0xff]  ;;  %v71_v32 = vld [vmem:[#allocation3 + $0x78] sm:$0xff] }
  0x3f   :  { %914 = vmatpush.bf16.msrb.mxu0 %v1451_v36  ;;  %v1692_v35 = vld [vmem:[#allocation6 + $0x64] sm:$0xf]  ;;  %v1220_v36 = vld [vmem:[#allocation6 + $0x68] sm:$0xf0]  ;;  %v1965_v43 = vpack.c.bf16 %v70_v26, %v62_v25  ;;  %v1967_v44 = vpack.c.bf16 %v69_v30, %v61_v27  ;;  %v1969_v47 = vpack.c.bf16 %v71_v32, %v63_v31  ;;  %v1212_v52 = vld [vmem:[#allocation6 + $0x58] sm:$0xf0] }
  0x40   :  { %928 = vmatpush.bf16.msrb.mxu1 %v1515_v37  ;;  %v1708_v37 = vld [vmem:[#allocation6 + $0xe4] sm:$0xf]  ;;  %v1284_v40 = vld [vmem:[#allocation6 + $0xe8] sm:$0xf0]  ;;  %v1706_v53 = vld [vmem:[#allocation6 + $0xd4] sm:$0xf] }
  0x41   :  { %942 = vmatpush.bf16.msrb.mxu2 %v1579_v38  ;;  %v1423_v38 = vor.u32 %v1742_v18, %v1420_v20  ;;  %v1724_v41 = vld [vmem:[#allocation6 + $0x164] sm:$0xf]  ;;  %v1412_v46 = vld [vmem:[#allocation6 + $0x1e8] sm:$0xf0]  ;;  %v1287_v49 = vor.u32 %v1708_v37, %v1284_v40  ;;  %v1722_v56 = vld [vmem:[#allocation6 + $0x154] sm:$0xf] }
  0x42   :  { %956 = vmatpush.bf16.msrb.mxu3 %v1643_v42  ;;  %v1348_v42 = vld [vmem:[#allocation6 + $0x168] sm:$0xf0]  ;;  %v1740_v45 = vld [vmem:[#allocation6 + $0x1e4] sm:$0xf]  ;;  %v1340_v57 = vld [vmem:[#allocation6 + $0x158] sm:$0xf0] }
  0x43   :  { %915 = vmatpush.bf16.msrb.mxu0 %v1443_v48  ;;  %v1223_v48 = vor.u32 %v1692_v35, %v1220_v36  ;;  %v1415_v54 = vor.u32 %v1740_v45, %v1412_v46  ;;  %v1738_v59 = vld [vmem:[#allocation6 + $0x1d4] sm:$0xf]  ;;  %v1404_v60 = vld [vmem:[#allocation6 + $0x1d8] sm:$0xf0]  ;;  %v1688_v0 = vld [vmem:[#allocation6 + $0x44] sm:$0xf] }
  0x44   :  { %929 = vmatpush.bf16.msrb.mxu1 %v1507_v50  ;;  %v1351_v50 = vor.u32 %v1724_v41, %v1348_v42  ;;  %v1204_v2 = vld [vmem:[#allocation6 + $0x48] sm:$0xf0]  ;;  %v1704_v3 = vld [vmem:[#allocation6 + $0xc4] sm:$0xf]  ;;  %v1407_v4 = vor.u32 %v1738_v59, %v1404_v60  ;;  %v1686_v14 = vld [vmem:[#allocation6 + $0x34] sm:$0xf] }
  0x45   :  { %943 = vmatpush.bf16.msrb.mxu2 %v1571_v51  ;;  %v1690_v51 = vld [vmem:[#allocation6 + $0x54] sm:$0xf]  ;;  %v1332_v7 = vld [vmem:[#allocation6 + $0x148] sm:$0xf0]  ;;  %v1736_v8 = vld [vmem:[#allocation6 + $0x1c4] sm:$0xf] }
  0x46   :  { %957 = vmatpush.bf16.msrb.mxu3 %v1635_v55  ;;  %v1276_v55 = vld [vmem:[#allocation6 + $0xd8] sm:$0xf0]  ;;  %v1215_v61 = vor.u32 %v1690_v51, %v1212_v52  ;;  %v1396_v9 = vld [vmem:[#allocation6 + $0x1c8] sm:$0xf0]  ;;  %v1702_v16 = vld [vmem:[#allocation6 + $0xb4] sm:$0xf] }
  0x47   :  { %916 = vmatpush.bf16.msrb.mxu0 %v1435_v63  ;;  %v1279_v62 = vor.u32 %v1706_v53, %v1276_v55  ;;  %v1343_v63 = vor.u32 %v1722_v56, %v1340_v57  ;;  %v1196_v15 = vld [vmem:[#allocation6 + $0x38] sm:$0xf0]  ;;  %v1399_v18 = vor.u32 %v1736_v8, %v1396_v9  ;;  %v1718_v20 = vld [vmem:[#allocation6 + $0x134] sm:$0xf]  ;;  %v1684_v27 = vld [vmem:[#allocation6 + $0x24] sm:$0xf] }
  0x48   :  { %930 = vmatpush.bf16.msrb.mxu1 %v1499_v5  ;;  %v1268_v5 = vld [vmem:[#allocation6 + $0xc8] sm:$0xf0]  ;;  %v1324_v21 = vld [vmem:[#allocation6 + $0x138] sm:$0xf0]  ;;  %v1734_v22 = vld [vmem:[#allocation6 + $0x1b4] sm:$0xf] }
  0x49   :  { %944 = vmatpush.bf16.msrb.mxu2 %v1563_v6  ;;  %v1720_v6 = vld [vmem:[#allocation6 + $0x144] sm:$0xf]  ;;  %v1271_v12 = vor.u32 %v1704_v3, %v1268_v5  ;;  %v1327_v26 = vor.u32 %v1718_v20, %v1324_v21  ;;  %v1252_v31 = vld [vmem:[#allocation6 + $0xa8] sm:$0xf0]  ;;  %v1682_v40 = vld [vmem:[#allocation6 + $0x14] sm:$0xf] }
  0x4a   :  { %958 = vmatpush.bf16.msrb.mxu3 %v1627_v11  ;;  %v1207_v11 = vor.u32 %v1688_v0, %v1204_v2  ;;  %v1335_v13 = vor.u32 %v1720_v6, %v1332_v7  ;;  %v1716_v32 = vld [vmem:[#allocation6 + $0x124] sm:$0xf]  ;;  %v1380_v35 = vld [vmem:[#allocation6 + $0x1a8] sm:$0xf0]  ;;  %v1180_v41 = vld [vmem:[#allocation6 + $0x18] sm:$0xf0] }
  0x4b   :  { %917 = vmatpush.bf16.msrb.mxu0 %v1427_v19  ;;  %v1260_v19 = vld [vmem:[#allocation6 + $0xb8] sm:$0xf0]  ;;  %v1698_v42 = vld [vmem:[#allocation6 + $0x94] sm:$0xf]  ;;  %v1183_v52 = vor.u32 %v1682_v40, %v1180_v41  ;;  %v1680_v53 = vld [vmem:[#allocation6 + $0x4] sm:$0xf] }
  0x4c   :  { %931 = vmatpush.bf16.msrb.mxu1 %v1491_v23  ;;  %v1388_v23 = vld [vmem:[#allocation6 + $0x1b8] sm:$0xf0]  ;;  %v1263_v25 = vor.u32 %v1702_v16, %v1260_v19  ;;  %v1696_v57 = vld [vmem:[#allocation6 + $0x84] sm:$0xf]  ;;  %v1236_v59 = vld [vmem:[#allocation6 + $0x88] sm:$0xf0] }
  0x4d   :  { %945 = vmatpush.bf16.msrb.mxu2 %v1555_v24  ;;  %v1199_v24 = vor.u32 %v1686_v14, %v1196_v15  ;;  %v1391_v30 = vor.u32 %v1734_v22, %v1388_v23  ;;  %v1244_v46 = vld [vmem:[#allocation6 + $0x98] sm:$0xf0]  ;;  %v1712_v60 = vld [vmem:[#allocation6 + $0x104] sm:$0xf]  ;;  %v1364_v0 = vld [vmem:[#allocation6 + $0x188] sm:$0xf0]  ;;  %v1239_v9 = vor.u32 %v1696_v57, %v1236_v59 }
  0x4e   :  { %959 = vmatpush.bf16.msrb.mxu3 %v1619_v28  ;;  %918 = vmatmul.bf16.vlgmr.msrb.gmra.mxu0 %v1963_v39  ;;  %v1188_v28 = vld [vmem:[#allocation6 + $0x28] sm:$0xf0]  ;;  %v1372_v51 = vld [vmem:[#allocation6 + $0x198] sm:$0xf0]  ;;  %v1247_v55 = vor.u32 %v1698_v42, %v1244_v46  ;;  %v1758_v2 = vld [vmem:[#allocation6 + $0x274] sm:$0xf] }
  0x4f   :  { %966 = vmatpush.bf16.msra.mxu0 %v1231_v29  ;;  %932 = vmatmul.bf16.vlgmr.msrb.gmra.mxu1 %v1967_v44  ;;  %v1700_v29 = vld [vmem:[#allocation6 + $0xa4] sm:$0xf]  ;;  %v1191_v36 = vor.u32 %v1684_v27, %v1188_v28  ;;  %v1484_v3 = vld [vmem:[#allocation6 + $0x278] sm:$0xf0]  ;;  %v1790_v7 = vld [vmem:[#allocation6 + $0x374] sm:$0xf] }
  0x50   :  { %980 = vmatpush.bf16.msra.mxu1 %v1295_v33  ;;  %946 = vmatmul.bf16.vlgmr.msrb.gmra.mxu2 %v1965_v43  ;;  %v1316_v33 = vld [vmem:[#allocation6 + $0x128] sm:$0xf0]  ;;  %v1255_v37 = vor.u32 %v1700_v29, %v1252_v31  ;;  %v1548_v6 = vld [vmem:[#allocation6 + $0x2f8] sm:$0xf0]  ;;  %v1487_v15 = vor.u32 %v1758_v2, %v1484_v3  ;;  %v1756_v19 = vld [vmem:[#allocation6 + $0x264] sm:$0xf] }
  0x51   :  { %994 = vmatpush.bf16.msra.mxu2 %v1359_v34  ;;  %960 = vmatmul.bf16.vlgmr.msrb.gmra.mxu3 %v1969_v47  ;;  %v1732_v34 = vld [vmem:[#allocation6 + $0x1a4] sm:$0xf]  ;;  %v1612_v8 = vld [vmem:[#allocation6 + $0x378] sm:$0xf0]  ;;  %v1476_v20 = vld [vmem:[#allocation6 + $0x268] sm:$0xf0] }
  0x52   :  { %1008 = vmatpush.bf16.msra.mxu3 %v1423_v38  ;;  %v1319_v38 = vor.u32 %v1716_v32, %v1316_v33  ;;  %v1383_v45 = vor.u32 %v1732_v34, %v1380_v35  ;;  %v1772_v21 = vld [vmem:[#allocation6 + $0x2e4] sm:$0xf]  ;;  %v1540_v23 = vld [vmem:[#allocation6 + $0x2e8] sm:$0xf0]  ;;  %v1479_v28 = vor.u32 %v1756_v19, %v1476_v20  ;;  %v1754_v31 = vld [vmem:[#allocation6 + $0x254] sm:$0xf] }
  0x53   :  { %967 = vmatpush.bf16.msra.mxu0 %v1223_v48  ;;  %v1714_v48 = vld [vmem:[#allocation6 + $0x114] sm:$0xf]  ;;  %v1668_v27 = vld [vmem:[#allocation6 + $0x3e8] sm:$0xf0]  ;;  %v1543_v29 = vor.u32 %v1772_v21, %v1540_v23  ;;  %v1468_v32 = vld [vmem:[#allocation6 + $0x258] sm:$0xf0] }
  0x54   :  { %981 = vmatpush.bf16.msra.mxu1 %v1287_v49  ;;  %v1308_v49 = vld [vmem:[#allocation6 + $0x118] sm:$0xf0]  ;;  %v1770_v33 = vld [vmem:[#allocation6 + $0x2d4] sm:$0xf]  ;;  %v1471_v41 = vor.u32 %v1754_v31, %v1468_v32  ;;  %v1752_v46 = vld [vmem:[#allocation6 + $0x244] sm:$0xf] }
  0x55   :  { %995 = vmatpush.bf16.msra.mxu2 %v1351_v50  ;;  %v1730_v50 = vld [vmem:[#allocation6 + $0x194] sm:$0xf]  ;;  %v1311_v56 = vor.u32 %v1714_v48, %v1308_v49  ;;  %v1532_v35 = vld [vmem:[#allocation6 + $0x2d8] sm:$0xf0]  ;;  %v1460_v48 = vld [vmem:[#allocation6 + $0x248] sm:$0xf0] }
  0x56   :  { %1009 = vmatpush.bf16.msra.mxu3 %v1415_v54  ;;  %v1172_v54 = vld [vmem:[#allocation6 + $0x8] sm:$0xf0]  ;;  %v1660_v40 = vld [vmem:[#allocation6 + $0x3d8] sm:$0xf0]  ;;  %v1535_v42 = vor.u32 %v1770_v33, %v1532_v35  ;;  %v1766_v57 = vld [vmem:[#allocation6 + $0x2b4] sm:$0xf] }
  0x57   :  { %968 = vmatpush.bf16.msra.mxu0 %v1215_v61  ;;  %v1375_v61 = vor.u32 %v1730_v50, %v1372_v51  ;;  %v1175_v5 = vor.u32 %v1680_v53, %v1172_v54  ;;  %v1524_v50 = vld [vmem:[#allocation6 + $0x2c8] sm:$0xf0]  ;;  %v1784_v51 = vld [vmem:[#allocation6 + $0x344] sm:$0xf]  ;;  %v1746_v19 = vld [vmem:[#allocation6 + $0x214] sm:$0xf] }
  0x58   :  { %982 = vmatpush.bf16.msra.mxu1 %v1279_v62  ;;  %v1300_v62 = vld [vmem:[#allocation6 + $0x108] sm:$0xf0]  ;;  %v1800_v53 = vld [vmem:[#allocation6 + $0x3c4] sm:$0xf]  ;;  %v1436_v20 = vld [vmem:[#allocation6 + $0x218] sm:$0xf0] }
  0x59   :  { %996 = vmatpush.bf16.msra.mxu2 %v1343_v63  ;;  %v1728_v63 = vld [vmem:[#allocation6 + $0x184] sm:$0xf]  ;;  %v1762_v21 = vld [vmem:[#allocation6 + $0x294] sm:$0xf]  ;;  %v1500_v23 = vld [vmem:[#allocation6 + $0x298] sm:$0xf0] }
  0x5a   :  { %1010 = vmatpush.bf16.msra.mxu3 %v1407_v4  ;;  %v1774_v4 = vld [vmem:[#allocation6 + $0x2f4] sm:$0xf]  ;;  %v1367_v14 = vor.u32 %v1728_v63, %v1364_v0  ;;  %v1644_v0 = vld [vmem:[#allocation6 + $0x3b8] sm:$0xf0]  ;;  %v1744_v31 = vld [vmem:[#allocation6 + $0x204] sm:$0xf] }
  0x5b   :  { %969 = vmatpush.bf16.msra.mxu0 %v1207_v11  ;;  %v1303_v11 = vor.u32 %v1712_v60, %v1300_v62  ;;  %v1551_v16 = vor.u32 %v1774_v4, %v1548_v6  ;;  %v1516_v60 = vld [vmem:[#allocation6 + $0x2b8] sm:$0xf0]  ;;  %v1798_v63 = vld [vmem:[#allocation6 + $0x3b4] sm:$0xf]  ;;  %v1444_v6 = vld [vmem:[#allocation6 + $0x228] sm:$0xf0] }
  0x5c   :  { %983 = vmatpush.bf16.msra.mxu1 %v1271_v12  ;;  %v1806_v12 = vld [vmem:[#allocation6 + $0x3f4] sm:$0xf]  ;;  %v1580_v62 = vld [vmem:[#allocation6 + $0x338] sm:$0xf0]  ;;  %v1519_v3 = vor.u32 %v1766_v57, %v1516_v60  ;;  %v1428_v32 = vld [vmem:[#allocation6 + $0x208] sm:$0xf0] }
  0x5d   :  { %997 = vmatpush.bf16.msra.mxu2 %v1335_v13  ;;  %v1676_v13 = vld [vmem:[#allocation6 + $0x3f8] sm:$0xf0]  ;;  %v1760_v33 = vld [vmem:[#allocation6 + $0x284] sm:$0xf]  ;;  %v1492_v35 = vld [vmem:[#allocation6 + $0x288] sm:$0xf0] }
  0x5e   :  { %1011 = vmatpush.bf16.msra.mxu3 %v1399_v18  ;;  %v1615_v18 = vor.u32 %v1790_v7, %v1612_v8  ;;  %v1679_v22 = vor.u32 %v1806_v12, %v1676_v13  ;;  %v1764_v7 = vld [vmem:[#allocation6 + $0x2a4] sm:$0xf]  ;;  %v1647_v8 = vor.u32 %v1798_v63, %v1644_v0  ;;  %v1572_v12 = vld [vmem:[#allocation6 + $0x328] sm:$0xf0] }
  0x5f   :  { %970 = vmatpush.bf16.msra.mxu0 %v1199_v24  ;;  %v1788_v24 = vld [vmem:[#allocation6 + $0x364] sm:$0xf] }
  0x60   :  { %984 = vmatpush.bf16.msra.mxu1 %v1263_v25  ;;  %v1604_v25 = vld [vmem:[#allocation6 + $0x368] sm:$0xf0]  ;;  %v1796_v13 = vld [vmem:[#allocation6 + $0x3a4] sm:$0xf] }
  0x61   :  { %998 = vmatpush.bf16.msra.mxu2 %v1327_v26  ;;  %v1804_v26 = vld [vmem:[#allocation6 + $0x3e4] sm:$0xf] }
  0x62   :  { %1012 = vmatpush.bf16.msra.mxu3 %v1391_v30  ;;  %v1607_v30 = vor.u32 %v1788_v24, %v1604_v25  ;;  %v1671_v34 = vor.u32 %v1804_v26, %v1668_v27  ;;  %v1778_v24 = vld [vmem:[#allocation6 + $0x314] sm:$0xf]  ;;  %v1564_v25 = vld [vmem:[#allocation6 + $0x318] sm:$0xf0] }
  0x63   :  { %971 = vmatpush.bf16.msra.mxu0 %v1191_v36  ;;  %v1786_v36 = vld [vmem:[#allocation6 + $0x354] sm:$0xf]  ;;  %v1628_v27 = vld [vmem:[#allocation6 + $0x398] sm:$0xf0] }
  0x64   :  { %985 = vmatpush.bf16.msra.mxu1 %v1255_v37  ;;  %v1596_v37 = vld [vmem:[#allocation6 + $0x358] sm:$0xf0]  ;;  %v1794_v26 = vld [vmem:[#allocation6 + $0x394] sm:$0xf] }
  0x65   :  { %999 = vmatpush.bf16.msra.mxu2 %v1319_v38  ;;  %v1802_v38 = vld [vmem:[#allocation6 + $0x3d4] sm:$0xf] }
  0x66   :  { %1013 = vmatpush.bf16.msra.mxu3 %v1383_v45  ;;  %v1599_v45 = vor.u32 %v1786_v36, %v1596_v37  ;;  %v1663_v49 = vor.u32 %v1802_v38, %v1660_v40  ;;  %v1776_v36 = vld [vmem:[#allocation6 + $0x304] sm:$0xf]  ;;  %v1556_v37 = vld [vmem:[#allocation6 + $0x308] sm:$0xf0] }
  0x67   :  { %972 = vmatpush.bf16.msra.mxu0 %v1183_v52  ;;  %v1588_v52 = vld [vmem:[#allocation6 + $0x348] sm:$0xf0]  ;;  %v1792_v38 = vld [vmem:[#allocation6 + $0x384] sm:$0xf] }
  0x68   :  { %986 = vmatpush.bf16.msra.mxu1 %v1247_v55  ;;  %v1750_v55 = vld [vmem:[#allocation6 + $0x234] sm:$0xf]  ;;  %v1620_v40 = vld [vmem:[#allocation6 + $0x388] sm:$0xf0] }
  0x69   :  { %1000 = vmatpush.bf16.msra.mxu2 %v1311_v56  ;;  %v1452_v56 = vld [vmem:[#allocation6 + $0x238] sm:$0xf0] }
  0x6a   :  { %1014 = vmatpush.bf16.msra.mxu3 %v1375_v61  ;;  %v1782_v61 = vld [vmem:[#allocation6 + $0x334] sm:$0xf]  ;;  %v1455_v2 = vor.u32 %v1750_v55, %v1452_v56 }
  0x6b   :  { %973 = vmatpush.bf16.msra.mxu0 %v1175_v5  ;;  %v1583_v4 = vor.u32 %v1782_v61, %v1580_v62  ;;  %v1748_v5 = vld [vmem:[#allocation6 + $0x224] sm:$0xf] }
  0x6c   :  { %987 = vmatpush.bf16.msra.mxu1 %v1239_v9  ;;  %v1508_v9 = vld [vmem:[#allocation6 + $0x2a8] sm:$0xf0] }
  0x6d   :  { %1001 = vmatpush.bf16.msra.mxu2 %v1303_v11  ;;  %v1780_v11 = vld [vmem:[#allocation6 + $0x324] sm:$0xf] }
  0x6e   :  { %1015 = vmatpush.bf16.msra.mxu3 %v1367_v14  ;;  %974 = vmatmul.bf16.vlgmr.msra.gmra.mxu0 %v1951_v58  ;;  %v1652_v58 = vld [vmem:[#allocation6 + $0x3c8] sm:$0xf0] }
  0x6f   :  { %1022 = vmatpush.bf16.msrb.mxu0 %v1487_v15  ;;  %988 = vmatmul.bf16.vlgmr.msra.gmra.mxu1 %v1957_v10  ;;  %v1591_v10 = vor.u32 %v1784_v51, %v1588_v52  ;;  %v1655_v59 = vor.u32 %v1800_v53, %v1652_v58  ;;  %v1636_v14 = vld [vmem:[#allocation6 + $0x3a8] sm:$0xf0]  ;;  %v1447_v15 = vor.u32 %v1748_v5, %v1444_v6 }
  0x70   :  { %1036 = vmatpush.bf16.msrb.mxu1 %v1551_v16  ;;  %1002 = vmatmul.bf16.vlgmr.msra.gmra.mxu2 %v1953_v1  ;;  %v1768_v1 = vld [vmem:[#allocation6 + $0x2c4] sm:$0xf]  ;;  %v1511_v16 = vor.u32 %v1764_v7, %v1508_v9 }
  0x71   :  { %1050 = vmatpush.bf16.msrb.mxu2 %v1615_v18  ;;  %1016 = vmatmul.bf16.vlgmr.msra.gmra.mxu3 %v1959_v17  ;;  %v1463_v17 = vor.u32 %v1752_v46, %v1460_v48  ;;  %v1527_v54 = vor.u32 %v1768_v1, %v1524_v50  ;;  %v1575_v18 = vor.u32 %v1780_v11, %v1572_v12  ;;  %v208_v48 = vld [vmem:[%s2000_s2] sm:$0x3] }
  0x72   :  { %1064 = vmatpush.bf16.msrb.mxu3 %v1679_v22  ;;  %v1639_v22 = vor.u32 %v1796_v13, %v1636_v14  ;;  %v1623_v46 = vor.u32 %v1792_v38, %v1620_v40  ;;  %v211_v14 = vperm.slane %v208_v48, 1 }
  0x73   :  { %1023 = vmatpush.bf16.msrb.mxu0 %v1479_v28  ;;  %v1439_v28 = vor.u32 %v1746_v19, %v1436_v20 }
  0x74   :  { %1037 = vmatpush.bf16.msrb.mxu1 %v1543_v29  ;;  %v1503_v29 = vor.u32 %v1762_v21, %v1500_v23 }
  0x75   :  { %1051 = vmatpush.bf16.msrb.mxu2 %v1607_v30  ;;  %v1567_v30 = vor.u32 %v1778_v24, %v1564_v25 }
  0x76   :  { %1065 = vmatpush.bf16.msrb.mxu3 %v1671_v34  ;;  %v1631_v34 = vor.u32 %v1794_v26, %v1628_v27 }
  0x77   :  { %1024 = vmatpush.bf16.msrb.mxu0 %v1471_v41  ;;  %v1431_v41 = vor.u32 %v1744_v31, %v1428_v32 }
  0x78   :  { %1038 = vmatpush.bf16.msrb.mxu1 %v1535_v42  ;;  %v1495_v42 = vor.u32 %v1760_v33, %v1492_v35 }
  0x79   :  { %1052 = vmatpush.bf16.msrb.mxu2 %v1599_v45  ;;  %v1559_v45 = vor.u32 %v1776_v36, %v1556_v37 }
  0x7a   :  { %1066 = vmatpush.bf16.msrb.mxu3 %v1663_v49  ;;  %v210_v49 = vperm.slane %v208_v48, 0 }
  0x7b   :  { %1025 = vmatpush.bf16.msrb.mxu0 %v1463_v17 }
  0x7c   :  { %1039 = vmatpush.bf16.msrb.mxu1 %v1527_v54 }
  0x7d   :  { %1053 = vmatpush.bf16.msrb.mxu2 %v1591_v10 }
  0x7e   :  { %1067 = vmatpush.bf16.msrb.mxu3 %v1655_v59 }
  0x7f   :  { %1026 = vmatpush.bf16.msrb.mxu0 %v1455_v2 }
  0x80   :  { %1040 = vmatpush.bf16.msrb.mxu1 %v1519_v3 }
  0x81   :  { %1054 = vmatpush.bf16.msrb.mxu2 %v1583_v4 }
  0x82   :  { %1068 = vmatpush.bf16.msrb.mxu3 %v1647_v8 }
  0x83   :  { %1027 = vmatpush.bf16.msrb.mxu0 %v1447_v15 }
  0x84   :  { %1041 = vmatpush.bf16.msrb.mxu1 %v1511_v16 }
  0x85   :  { %1055 = vmatpush.bf16.msrb.mxu2 %v1575_v18 }
  0x86   :  { %1069 = vmatpush.bf16.msrb.mxu3 %v1639_v22 }
  0x87   :  { %1028 = vmatpush.bf16.msrb.mxu0 %v1439_v28 }
  0x88   :  { %1042 = vmatpush.bf16.msrb.mxu1 %v1503_v29 }
  0x89   :  { %1056 = vmatpush.bf16.msrb.mxu2 %v1567_v30 }
  0x8a   :  { %1070 = vmatpush.bf16.msrb.mxu3 %v1631_v34 }
  0x8b   :  { %1029 = vmatpush.bf16.msrb.mxu0 %v1431_v41 }
  0x8c   :  { %1043 = vmatpush.bf16.msrb.mxu1 %v1495_v42 }
  0x8d   :  { %1057 = vmatpush.bf16.msrb.mxu2 %v1559_v45 }
  0x8e   :  { %1071 = vmatpush.bf16.msrb.mxu3 %v1623_v46  ;;  %1030 = vmatmul.bf16.vlgmr.msrb.gmra.mxu0 %v1963_v39 }
  0x8f   :  { %1044 = vmatmul.bf16.vlgmr.msrb.gmra.mxu1 %v1967_v44 }
  0x90   :  { %1058 = vmatmul.bf16.vlgmr.msrb.gmra.mxu2 %v1965_v43 }
  0x91   :  { %1072 = vmatmul.bf16.vlgmr.msrb.gmra.mxu3 %v1969_v47 }
  0xab   :  { %v863_v1 = vpop.f32.mrf.mxu0 }
  0xac   :  { %v877_v50 = vpop.f32.mrf.mxu1  ;;  %v864_v51 = vadd.f32 %v863_v1, %v210_v49 }
  0xae   :  { %v878_v58 = vadd.f32 %v877_v50, %v864_v51 }
  0xb3   :  { %v891_v52 = vpop.f32.mrf.mxu2  ;;  %v865_v17 = vpop.f32.mrf.mxu0 }
  0xb4   :  { %v905_v53 = vpop.f32.mrf.mxu3  ;;  %v879_v54 = vpop.f32.mrf.mxu1  ;;  %v892_v39 = vadd.f32 %v891_v52, %v878_v58  ;;  %v866_v10 = vadd.f32 %v865_v17, %v210_v49 }
  0xb6   :  { %v906_v44 = vadd.f32 %v905_v53, %v892_v39  ;;  %v880_v43 = vadd.f32 %v879_v54, %v866_v10 }
  0xbb   :  { %v893_v55 = vpop.f32.mrf.mxu2 }
  0xbc   :  { %v907_v56 = vpop.f32.mrf.mxu3  ;;  %v894_v60 = vadd.f32 %v893_v55, %v880_v43 }
  0xbe   :  { %v908_v62 = vadd.f32 %v907_v56, %v894_v60 }
  0xcb   :  { %v919_v47 = vpop.f32.mrf.mxu0 }
  0xcc   :  { %v920_v57 = vadd.f32 %v919_v47, %v906_v44  ;;  %v933_v59 = vpop.f32.mrf.mxu1 }
  0xce   :  { %v934_v61 = vadd.f32 %v933_v59, %v920_v57 }
  0xd3   :  { %v947_v63 = vpop.f32.mrf.mxu2  ;;  %v921_v2 = vpop.f32.mrf.mxu0 }
  0xd4   :  { %v948_v0 = vadd.f32 %v947_v63, %v934_v61  ;;  %v961_v3 = vpop.f32.mrf.mxu3  ;;  %v922_v4 = vadd.f32 %v921_v2, %v908_v62  ;;  %v935_v6 = vpop.f32.mrf.mxu1 }
  0xd6   :  { %v962_v5 = vadd.f32 %v961_v3, %v948_v0  ;;  %v936_v7 = vadd.f32 %v935_v6, %v922_v4 }
  0xd8   :  { %1078 = vmax.xlane.f32.xlu0 %v962_v5 }
  0xdb   :  { %v949_v8 = vpop.f32.mrf.mxu2 }
  0xdc   :  { %v950_v9 = vadd.f32 %v949_v8, %v936_v7  ;;  %v963_v11 = vpop.f32.mrf.mxu3 }
  0xde   :  { %v964_v12 = vadd.f32 %v963_v11, %v950_v9 }
  0xe0   :  { %1080 = vmax.xlane.f32.xlu0 %v964_v12 }
  0xeb   :  { %v975_v13 = vpop.f32.mrf.mxu0 }
  0xec   :  { %v989_v15 = vpop.f32.mrf.mxu1  ;;  %v976_v16 = vadd.f32 %v975_v13, %v211_v14 }
  0xee   :  { %v990_v20 = vadd.f32 %v989_v15, %v976_v16  ;;  %v1123_v16 = vld [vmem:[%s2001_s3 + $0x8] sm:$0xff] }
  0xf3   :  { %v1003_v18 = vpop.f32.mrf.mxu2  ;;  %v977_v21 = vpop.f32.mrf.mxu0 }
  0xf4   :  { %v1017_v19 = vpop.f32.mrf.mxu3  ;;  %v991_v22 = vpop.f32.mrf.mxu1  ;;  %v1004_v23 = vadd.f32 %v1003_v18, %v990_v20  ;;  %v978_v24 = vadd.f32 %v977_v21, %v211_v14  ;;  %v1122_v14 = vld [vmem:[%s2001_s3] sm:$0xff] }
  0xf6   :  { %v1018_v26 = vadd.f32 %v1017_v19, %v1004_v23  ;;  %v992_v27 = vadd.f32 %v991_v22, %v978_v24  ;;  %v1918_v24 = vmov 0.0  }
  0xf7   :  { %55 = vst.msk [vmem:[#allocation2] sm:$0x1] %vm54_vm1, %v1918_v24 }
  0xfb   :  { %v1005_v25 = vpop.f32.mrf.mxu2 }
  0xfc   :  { %v1019_v28 = vpop.f32.mrf.mxu3  ;;  %v1006_v32 = vadd.f32 %v1005_v25, %v992_v27 }
  0xfe   :  { %v1020_v35 = vadd.f32 %v1019_v28, %v1006_v32  ;;  %v1126_v32 = vld [vmem:[#allocation2] sm:$0x1] }
 0x10b   :  { %v1031_v29 = vpop.f32.mrf.mxu0 }
 0x10c   :  { %v1032_v30 = vadd.f32 %v1031_v29, %v1018_v26  ;;  %v1045_v31 = vpop.f32.mrf.mxu1 }
 0x10e   :  { %v1046_v33 = vadd.f32 %v1045_v31, %v1032_v30 }
 0x113   :  { %v1059_v34 = vpop.f32.mrf.mxu2  ;;  %v1033_v38 = vpop.f32.mrf.mxu0 }
 0x114   :  { %v1060_v36 = vadd.f32 %v1059_v34, %v1046_v33  ;;  %v1073_v37 = vpop.f32.mrf.mxu3  ;;  %v1034_v41 = vadd.f32 %v1033_v38, %v1020_v35  ;;  %v1047_v42 = vpop.f32.mrf.mxu1 }
 0x116   :  { %v1074_v40 = vadd.f32 %v1073_v37, %v1060_v36  ;;  %v1048_v45 = vadd.f32 %v1047_v42, %v1034_v41 }
 0x118   :  { %1096 = vmax.xlane.f32.xlu1 %v1074_v40 }
 0x11b   :  { %v1061_v46 = vpop.f32.mrf.mxu2 }
 0x11c   :  { %v1062_v48 = vadd.f32 %v1061_v46, %v1048_v45  ;;  %v1075_v1 = vpop.f32.mrf.mxu3 }
 0x11e   :  { %v1076_v49 = vadd.f32 %v1075_v1, %v1062_v48 }
 0x120   :  { %1098 = vmax.xlane.f32.xlu1 %v1076_v49 }
 0x14b   :  { %v1079_v50 = vpop.xlane.xlu0 %1078 }
 0x14c   :  { %v1082_v51 = vsub.f32 %v962_v5, %v1079_v50 }
 0x14e   :  { %v1084_v52 = vmul.f32 1.442695, %v1082_v51 }
 0x150   :  { %1818 = vpow2.f32 %v1084_v52 }
 0x153   :  { %v1081_v53 = vpop.xlane.xlu0 %1080 }
 0x154   :  { %v1083_v58 = vsub.f32 %v964_v12, %v1081_v53 }
 0x156   :  { %v1819_v17 = vpop.eup %1818  ;;  %v1086_v54 = vmul.f32 1.442695, %v1083_v58 }
 0x157   :  { %1088 = vadd.xlane.f32.xlu2 %v1819_v17 }
 0x158   :  { %1820 = vpow2.f32 %v1086_v54 }
 0x15e   :  { %v1821_v39 = vpop.eup %1820 }
 0x15f   :  { %1090 = vadd.xlane.f32.xlu2 %v1821_v39 }
 0x18b   :  { %v1097_v10 = vpop.xlane.xlu1 %1096 }
 0x18c   :  { %v1100_v44 = vsub.f32 %v1074_v40, %v1097_v10 }
 0x18e   :  { %v1102_v55 = vmul.f32 1.442695, %v1100_v44 }
 0x190   :  { %1822 = vpow2.f32 %v1102_v55 }
 0x193   :  { %v1099_v43 = vpop.xlane.xlu1 %1098 }
 0x194   :  { %v1101_v56 = vsub.f32 %v1076_v49, %v1099_v43 }
 0x196   :  { %v1823_v47 = vpop.eup %1822  ;;  %v1104_v57 = vmul.f32 1.442695, %v1101_v56 }
 0x197   :  { %1106 = vadd.xlane.f32.xlu0 %v1823_v47 }
 0x198   :  { %1824 = vpow2.f32 %v1104_v57 }
 0x19e   :  { %v1825_v59 = vpop.eup %1824 }
 0x19f   :  { %1108 = vadd.xlane.f32.xlu1 %v1825_v59 }
 0x1ca   :  { %v1089_v60 = vpop.xlane.xlu2 %1088 }
 0x1cb   :  { %1826 = vrcp.f32 %v1089_v60 }
 0x1d1   :  { %v1827_v63 = vpop.eup %1826 }
 0x1d2   :  { %v1091_v62 = vpop.xlane.xlu2 %1090  ;;  %v1094_v3 = vmul.f32 %v1827_v63, %v1819_v17 }
 0x20a   :  { %v1107_v61 = vpop.xlane.xlu0 %1106 }
 0x20b   :  { %1828 = vrcp.f32 %v1107_v61 }
 0x20c   :  { %1830 = vrcp.f32 %v1091_v62 }
 0x211   :  { %v1829_v0 = vpop.eup %1828 }
 0x212   :  { %v1109_v2 = vpop.xlane.xlu1 %1108  ;;  %v1112_v4 = vmul.f32 %v1829_v0, %v1823_v47  ;;  %v1831_v7 = vpop.eup %1830 }
 0x213   :  { %1832 = vrcp.f32 %v1109_v2  ;;  %v1095_v9 = vmul.f32 %v1831_v7, %v1821_v39 }
 0x214   :  { %v1114_v5 = vsub.f32 %v1112_v4, %v1094_v3 }
 0x216   :  { %v1116_v6 = vmul.f32 %v1114_v5, %v1114_v5 }
 0x218   :  { %1118 = vadd.xlane.f32.xlu2 %v1116_v6 }
 0x219   :  { %v1833_v8 = vpop.eup %1832 }
 0x21a   :  { %v1113_v11 = vmul.f32 %v1833_v8, %v1825_v59 }
 0x21c   :  { %v1115_v12 = vsub.f32 %v1113_v11, %v1095_v9 }
 0x21e   :  { %v1117_v13 = vmul.f32 %v1115_v12, %v1115_v12 }
 0x220   :  { %1120 = vadd.xlane.f32.xlu0 %v1117_v13 }
 0x28b   :  { %v1119_v15 = vpop.xlane.xlu2 %1118 }
 0x28c   :  { %v1124_v18 = vmul.f32 %v1122_v14, %v1119_v15 }
 0x28e   :  { %v1128_v21 = vsel %vm1127_vm0, %v1124_v18, 0.0 }
 0x293   :  { %v1121_v19 = vpop.xlane.xlu0 %1120 }
 0x294   :  { %v1125_v20 = vmul.f32 %v1123_v16, %v1121_v19 }
 0x296   :  { %v1129_v22 = vsel %vm1127_vm0, %v1125_v20, 0.0 }
 0x297   :  { %v1130_v23 = vadd.f32 %v1129_v22, %v1128_v21 }
 0x299   :  { %1131 = vadd.xlane.f32.xlu1 %v1130_v23 }
 0x30c   :  { %v1132_v25 = vpop.xlane.xlu1 %1131 }
 0x30d   :  { %v1133_v26 = vrot.slane %v1132_v25, 4 }
 0x30f   :  { %v1134_v27 = vadd.f32 %v1133_v26, %v1132_v25 }
 0x311   :  { %v1135_v28 = vrot.slane %v1134_v27, 2 }
 0x313   :  { %v1136_v29 = vadd.f32 %v1135_v28, %v1134_v27 }
 0x315   :  { %v1137_v30 = vrot.slane %v1136_v29, 1 }
 0x317   :  { %v1138_v31 = vadd.f32 %v1137_v30, %v1136_v29 }
 0x319   :  { %1808 = vpush %v1138_v31 }
 0x34a   :  { %s1809_s3 = spop %1808 }
 0x34b   :  { %v1140_v33 = vstv %s1809_s3 }
 0x34c   :  { %v1141_v34 = vadd.f32 %v1140_v33, %v1126_v32 }
 0x34e   :  { %1143 = vst.msk [vmem:[#allocation2] sm:$0x1] %vm54_vm1, %v1141_v34 }
 0x355   :  { %v1147_v35 = vld [vmem:[#allocation2] sm:$0x1] }
 0x356   :  { %v1148_v36 = vmul.f32 0.00390625, %v1147_v35 }
 0x358   :  { %1149 = vst.msk [vmem:[#allocation8] sm:$0x1] %vm54_vm1, %v1148_v36 }
 0x359   :  { %1160 = dma.vmem_to_hbm [thread:$0]  %s1156_s7, 16, %s1158_s10, [#allocation5]  }
 0x35a   :  { %1910 = dma.done.wait [#allocation5], 16  }
 0x35b   :  { %1911 = vsyncadd [#allocation5], 4294967280 }
 0x35c   :  { %1165 = vsyncpa [#allocation4], 1 }
 0x35d   :  { %1166 = vsyncpa [#allocation7], 1 }
 0x35e   :  { %1167 = vsyncpa [#allocation5], 1 }

</bundles_post_ra>
